<compile_context>
chip_gen: v5e
topology: v5e:2x2
jax: 0.10.0
libtpu: 0.0.40
codegen_flags: <defaults>
</compile_context>

<pallas_src>
import math

import jax
import jax.numpy as jnp
from jax import lax
from jax.experimental import pallas as pl
from jax.experimental.pallas import tpu as pltpu

# Contract last dim of x (tm, tk) with last dim of W (tn, tk) -> (tm, tn).
_DNUMS = (((1,), (1,)), ((), ()))


def _linear_kernel_f32(x_ref, w_ref, o_ref):
    """f32 output: accumulate directly into the resident output block."""
    @pl.when(pl.program_id(2) == 0)
    def _():
        o_ref[...] = jnp.zeros_like(o_ref)

    o_ref[...] += lax.dot_general(
        x_ref[...], w_ref[...],
        dimension_numbers=_DNUMS,
        preferred_element_type=jnp.float32,
    )


def _linear_kernel_acc(x_ref, w_ref, o_ref, acc_ref):
    """Low-precision output: keep an f32 VMEM accumulator, cast on the last k step."""
    @pl.when(pl.program_id(2) == 0)
    def _():
        acc_ref[...] = jnp.zeros_like(acc_ref)

    acc_ref[...] += lax.dot_general(
        x_ref[...], w_ref[...],
        dimension_numbers=_DNUMS,
        preferred_element_type=jnp.float32,
    )

    @pl.when(pl.program_id(2) == pl.num_programs(2) - 1)
    def _():
        o_ref[...] = acc_ref[...].astype(o_ref.dtype)


def _round_up(x, m):
    return ((x + m - 1) // m) * m


def softmax_product_forward(x, weight, *, tm=None, tn=None, tk=None):
    """y = x @ weight.T  (F.linear with no bias).

    x:      (batch, in_features)
    weight: (out_features, in_features)   -- PyTorch convention, NOT transposed.
    """
    M, K = x.shape
    N, K2 = weight.shape
    assert K == K2, "in_features mismatch"

    # Minimum sublane multiple depends on dtype packing.
    sub = 16 if x.dtype == jnp.bfloat16 else 8

    # Adaptive tiles: big enough to amortize ~0.35 us/grid-step overhead and
    # feed the 128/256-wide MXU, small enough for default scoped VMEM with
    # double buffering on all generations (<= ~3.5 MiB at max tile in f32).
    if tm is None:
        tm = min(_round_up(M, sub), 256)
    if tn is None:
        tn = min(_round_up(N, 128), 512)
    if tk is None:
        tk = min(_round_up(K, 128), 512)

    # Zero-pad to tile multiples (zeros along K contribute nothing).
    Mp, Np, Kp = _round_up(M, tm), _round_up(N, tn), _round_up(K, tk)
    xp = x if (Mp == M and Kp == K) else jnp.pad(x, ((0, Mp - M), (0, Kp - K)))
    wp = weight if (Np == N and Kp == K) else jnp.pad(
        weight, ((0, Np - N), (0, Kp - K)))

    grid = (Mp // tm, Np // tn, Kp // tk)
    out_dtype = x.dtype

    direct = out_dtype == jnp.float32
    kernel = _linear_kernel_f32 if direct else _linear_kernel_acc
    scratch = [] if direct else [pltpu.VMEM((tm, tn), jnp.float32)]

    out = pl.pallas_call(
        kernel,
        out_shape=jax.ShapeDtypeStruct((Mp, Np), out_dtype),
        grid_spec=pltpu.PrefetchScalarGridSpec(
            num_scalar_prefetch=0,
            grid=grid,
            in_specs=[
                # x tile: (tm, tk)
                pl.BlockSpec((tm, tk), lambda i, j, k: (i, k)),
                # W tile in native (out, in) layout: (tn, tk) -- no transpose
                # materialized in HBM; the MXU consumes it via dot_general.
                pl.BlockSpec((tn, tk), lambda i, j, k: (j, k)),
            ],
            out_specs=pl.BlockSpec((tm, tn), lambda i, j, k: (i, j)),
            scratch_shapes=scratch,
        ),
        compiler_params=pltpu.CompilerParams(
            dimension_semantics=("parallel", "parallel", "arbitrary"),
        ),
    )(xp, wp)

    if Mp != M or Np != N:
        out = out[:M, :N]
    return out


def xavier_uniform(key, out_features, in_features, dtype=jnp.float32):
    # matches nn.init.xavier_uniform_ (gain=1): U(-a, a), a = sqrt(6/(fan_in+fan_out))
    bound = math.sqrt(6.0 / (in_features + out_features))
    return jax.random.uniform(
        key, (out_features, in_features), dtype=dtype, minval=-bound, maxval=bound
    )


if __name__ == "__main__":
    key = jax.random.PRNGKey(0)
    k_x, k_w, k_x2, k_w2 = jax.random.split(key, 4)

    # Case 1: the original demo shapes (single grid step after clamping).
    batch, in_features, out_features = 8, 128, 256
    x = jax.random.normal(k_x, (batch, in_features), dtype=jnp.float32)
    weight = xavier_uniform(k_w, out_features, in_features)

    y = jax.block_until_ready(softmax_product_forward(x, weight))
    y_ref = x @ weight.T
    assert y.shape == (batch, out_features)
    assert jnp.allclose(y, y_ref, atol=1e-5, rtol=1e-5), "mismatch vs reference (case 1)"

    # Case 2: odd, non-tile-aligned shapes exercise the padding/slicing path.
    batch2, in2, out2 = 5, 96, 200
    x2 = jax.random.normal(k_x2, (batch2, in2), dtype=jnp.float32)
    w2 = xavier_uniform(k_w2, out2, in2)

    y2 = jax.block_until_ready(softmax_product_forward(x2, w2))
    y2_ref = x2 @ w2.T
    assert y2.shape == (batch2, out2)
    assert jnp.allclose(y2, y2_ref, atol=1e-5, rtol=1e-5), "mismatch vs reference (case 2)"

    print("KERNEL_OK")
</pallas_src>

<mosaic_0001>
module attributes {stable_mosaic.version = 11 : i64} {
  func.func @_linear_kernel_f32(%arg0: i32, %arg1: i32, %arg2: i32, %arg3: memref<8x128xf32, #tpu.memory_space<vmem>>, %arg4: memref<256x128xf32, #tpu.memory_space<vmem>>, %arg5: memref<8x256xf32, #tpu.memory_space<vmem>>) attributes {dimension_semantics = [#tpu.dimension_semantics<parallel>, #tpu.dimension_semantics<parallel>, #tpu.dimension_semantics<arbitrary>], iteration_bounds = array<i64: 1, 1, 1>, scalar_prefetch = 0 : i64, scratch_operands = 0 : i64, tpu.core_type = #tpu.core_type<tc>, window_params = [{transform_indices = @transform_0, window_bounds = array<i64: 8, 128>}, {transform_indices = @transform_1, window_bounds = array<i64: 256, 128>}, {transform_indices = @transform_2, window_bounds = array<i64: 8, 256>}]} {
    %c0_i32 = arith.constant 0 : i32
    %0 = arith.cmpi eq, %arg2, %c0_i32 : i32
    %1 = arith.extui %0 : i1 to i32
    %c0_i32_0 = arith.constant 0 : i32
    %2 = arith.cmpi ne, %1, %c0_i32_0 : i32
    scf.if %2 {
      %cst_8 = arith.constant 0.000000e+00 : f32
      %9 = vector.broadcast %cst_8 : f32 to vector<8x256xf32>
      %c0_9 = arith.constant 0 : index
      %c0_10 = arith.constant 0 : index
      %10 = vector.load %arg5[%c0_9, %c0_10] : memref<8x256xf32, #tpu.memory_space<vmem>>, vector<8x256xf32>
      tpu.vector_store %arg5[%c0_9, %c0_10], %9 {strides = array<i32>} : memref<8x256xf32, #tpu.memory_space<vmem>>, vector<8x256xf32>,
    } else {
    }
    %c0 = arith.constant 0 : index
    %c0_1 = arith.constant 0 : index
    %3 = vector.load %arg5[%c0, %c0_1] : memref<8x256xf32, #tpu.memory_space<vmem>>, vector<8x256xf32>
    %c0_2 = arith.constant 0 : index
    %c0_3 = arith.constant 0 : index
    %4 = vector.load %arg3[%c0_2, %c0_3] : memref<8x128xf32, #tpu.memory_space<vmem>>, vector<8x128xf32>
    %c0_4 = arith.constant 0 : index
    %c0_5 = arith.constant 0 : index
    %5 = vector.load %arg4[%c0_4, %c0_5] : memref<256x128xf32, #tpu.memory_space<vmem>>, vector<256x128xf32>
    %cst = arith.constant dense<0.000000e+00> : vector<8x256xf32>
    %6 = tpu.matmul %4, %5, %cst {dimension_numbers = #tpu.dot_dimension_numbers<[1], [1], [0], [0], [0, 0, 1, 0], [], []>} : vector<8x128xf32>, vector<256x128xf32>, vector<8x256xf32> -> vector<8x256xf32>
    %7 = arith.addf %3, %6 : vector<8x256xf32>
    %c0_6 = arith.constant 0 : index
    %c0_7 = arith.constant 0 : index
    %8 = vector.load %arg5[%c0_6, %c0_7] : memref<8x256xf32, #tpu.memory_space<vmem>>, vector<8x256xf32>
    tpu.vector_store %arg5[%c0_6, %c0_7], %7 {strides = array<i32>} : memref<8x256xf32, #tpu.memory_space<vmem>>, vector<8x256xf32>,
    return
  }
  func.func @transform_0(%arg0: i32, %arg1: i32, %arg2: i32) -> (i32, i32) {
    %c0_i32 = arith.constant 0 : i32
    return %arg0, %arg2 : i32, i32
  }
  func.func @transform_1(%arg0: i32, %arg1: i32, %arg2: i32) -> (i32, i32) {
    %c0_i32 = arith.constant 0 : i32
    return %arg1, %arg2 : i32, i32
  }
  func.func @transform_2(%arg0: i32, %arg1: i32, %arg2: i32) -> (i32, i32) {
    %c0_i32 = arith.constant 0 : i32
    return %arg0, %arg1 : i32, i32
  }
}

</mosaic_0001>

<bundles_post_ra>
// kernel: tpu_custom_call.1
= control target key start
LH: loop header
LB: loop body
LE: loop exit
PB: predicated region body
PF: predicated region fallthrough
CT: control target
= control target key end

     0   :  { %7 = vsyncpa [#allocation3], 0  ;;  %s258_s0 = inlined_call_operand.hbm [shape: f32[8,128], index: 0, kind: input, shape index: {}]   ;;  %s259_s1 = inlined_call_operand.hbm [shape: f32[256,128], index: 1, kind: input, shape index: {}]   ;;  %s260_s2 = inlined_call_operand.hbm [shape: f32[8,256], index: 2, kind: output, shape index: {}]  }
   0x1   :  { %8 = vsyncpa [#allocation6], 0 }
   0x2   :  { %9 = vsyncpa [#allocation4], 0  ;;  %s15_s11 = sshll.u32 %s258_s0, 4  ;;  %s229_s12 = smov [#allocation2]   ;;  %s16_s11 = int_to_ptr.hbm [resolvable:$true] %s15_s11 }
   0x3   :  { %s17_s13 = sshll.u32 %s229_s12, 4  ;;  %s25_s16 = sshll.u32 %s259_s1, 4  ;;  %s18_s13 = int_to_ptr.vmem [resolvable:$true] %s17_s13  ;;  %s26_s16 = int_to_ptr.hbm [resolvable:$true] %s25_s16 }
   0x4   :  { %20 = dma.hbm_to_vmem [thread:$0]  %s16_s11, 128, %s18_s13, [#allocation3]  }
   0x5   :  { %s230_s17 = smov [#allocation5]   ;;  %s231_s19 = smov 128  }
   0x6   :  { %s27_s18 = sshll.u32 %s230_s17, 4  ;;  %s232_s20 = smov 8   ;;  %s28_s18 = int_to_ptr.vmem [resolvable:$true] %s27_s18 }
   0x7   :  { %33 = dma.hbm_to_vmem [thread:$0]  %s26_s16, 4096, %s28_s18, [#allocation6], %s231_s19, %s231_s19, %s232_s20  }
   0x8   :  { %223 = dma.done.wait [#allocation3], 128  }
   0x9   :  { %224 = vsyncadd [#allocation3], 4294967168 }
   0xa   :  { %225 = dma.done.wait [#allocation6], 4096  }
   0xb   :  { %226 = vsyncadd [#allocation6], 4294963200  ;;  %v66_v0 = vld [vmem:[#allocation5 + $0x78] sm:$0xff]  ;;  %v65_v2 = vld [vmem:[#allocation5 + $0x70] sm:$0xff]  ;;  %s233_s0 = smov [#allocation7]   ;;  %s134_s23 = sshll.u32 %s260_s2, 4  ;;  %s135_s23 = int_to_ptr.hbm [resolvable:$true] %s134_s23 }
   0xc   :  { %v82_v1 = vld [vmem:[#allocation5 + $0xf8] sm:$0xff]  ;;  %83 = vmatpush.xpose.msra.mxu0 %v66_v0  ;;  %v81_v3 = vld [vmem:[#allocation5 + $0xf0] sm:$0xff]  ;;  %v64_v4 = vld [vmem:[#allocation5 + $0x68] sm:$0xff]  ;;  %s132_s1 = sshll.u32 %s233_s0, 4  ;;  %s133_s1 = int_to_ptr.vmem [resolvable:$true] %s132_s1 }
   0xd   :  { %103 = vmatpush.xpose.msra.mxu1 %v82_v1  ;;  %v80_v5 = vld [vmem:[#allocation5 + $0xe8] sm:$0xff]  ;;  %v63_v6 = vld [vmem:[#allocation5 + $0x60] sm:$0xff]  ;;  %v62_v8 = vld [vmem:[#allocation5 + $0x58] sm:$0xff] }
   0xe   :  { %v79_v7 = vld [vmem:[#allocation5 + $0xe0] sm:$0xff]  ;;  %v78_v9 = vld [vmem:[#allocation5 + $0xd8] sm:$0xff]  ;;  %v61_v10 = vld [vmem:[#allocation5 + $0x50] sm:$0xff] }
   0xf   :  { %v77_v11 = vld [vmem:[#allocation5 + $0xd0] sm:$0xff]  ;;  %v60_v12 = vld [vmem:[#allocation5 + $0x48] sm:$0xff]  ;;  %v59_v14 = vld [vmem:[#allocation5 + $0x40] sm:$0xff] }
  0x10   :  { %84 = vmatpush.xpose.msra.mxu0 %v65_v2  ;;  %v76_v13 = vld [vmem:[#allocation5 + $0xc8] sm:$0xff]  ;;  %v75_v15 = vld [vmem:[#allocation5 + $0xc0] sm:$0xff]  ;;  %v58_v16 = vld [vmem:[#allocation5 + $0x38] sm:$0xff] }
  0x11   :  { %104 = vmatpush.xpose.msra.mxu1 %v81_v3  ;;  %v74_v17 = vld [vmem:[#allocation5 + $0xb8] sm:$0xff]  ;;  %v57_v18 = vld [vmem:[#allocation5 + $0x30] sm:$0xff]  ;;  %v56_v20 = vld [vmem:[#allocation5 + $0x28] sm:$0xff] }
  0x12   :  { %v73_v19 = vld [vmem:[#allocation5 + $0xb0] sm:$0xff]  ;;  %v72_v21 = vld [vmem:[#allocation5 + $0xa8] sm:$0xff]  ;;  %v55_v22 = vld [vmem:[#allocation5 + $0x20] sm:$0xff] }
  0x13   :  { %v71_v23 = vld [vmem:[#allocation5 + $0xa0] sm:$0xff]  ;;  %v54_v24 = vld [vmem:[#allocation5 + $0x18] sm:$0xff]  ;;  %v53_v26 = vld [vmem:[#allocation5 + $0x10] sm:$0xff] }
  0x14   :  { %85 = vmatpush.xpose.msra.mxu0 %v64_v4  ;;  %v70_v25 = vld [vmem:[#allocation5 + $0x98] sm:$0xff]  ;;  %v69_v27 = vld [vmem:[#allocation5 + $0x90] sm:$0xff]  ;;  %v52_v28 = vld [vmem:[#allocation5 + $0x8] sm:$0xff] }
  0x15   :  { %105 = vmatpush.xpose.msra.mxu1 %v80_v5  ;;  %v68_v29 = vld [vmem:[#allocation5 + $0x88] sm:$0xff]  ;;  %v51_v30 = vld [vmem:[#allocation5] sm:$0xff]  ;;  %v50_v32 = vld [vmem:[#allocation2] sm:$0xff] }
  0x16   :  { %v67_v31 = vld [vmem:[#allocation5 + $0x80] sm:$0xff] }
  0x18   :  { %86 = vmatpush.xpose.msra.mxu0 %v63_v6 }
  0x19   :  { %106 = vmatpush.xpose.msra.mxu1 %v79_v7 }
  0x1c   :  { %87 = vmatpush.xpose.msra.mxu0 %v62_v8 }
  0x1d   :  { %107 = vmatpush.xpose.msra.mxu1 %v78_v9 }
  0x20   :  { %88 = vmatpush.xpose.msra.mxu0 %v61_v10 }
  0x21   :  { %108 = vmatpush.xpose.msra.mxu1 %v77_v11 }
  0x24   :  { %89 = vmatpush.xpose.msra.mxu0 %v60_v12 }
  0x25   :  { %109 = vmatpush.xpose.msra.mxu1 %v76_v13 }
  0x28   :  { %90 = vmatpush.xpose.msra.mxu0 %v59_v14 }
  0x29   :  { %110 = vmatpush.xpose.msra.mxu1 %v75_v15 }
  0x2c   :  { %91 = vmatpush.xpose.msra.mxu0 %v58_v16 }
  0x2d   :  { %111 = vmatpush.xpose.msra.mxu1 %v74_v17 }
  0x30   :  { %92 = vmatpush.xpose.msra.mxu0 %v57_v18 }
  0x31   :  { %112 = vmatpush.xpose.msra.mxu1 %v73_v19 }
  0x34   :  { %93 = vmatpush.xpose.msra.mxu0 %v56_v20 }
  0x35   :  { %113 = vmatpush.xpose.msra.mxu1 %v72_v21 }
  0x38   :  { %94 = vmatpush.xpose.msra.mxu0 %v55_v22 }
  0x39   :  { %114 = vmatpush.xpose.msra.mxu1 %v71_v23 }
  0x3c   :  { %95 = vmatpush.xpose.msra.mxu0 %v54_v24 }
  0x3d   :  { %115 = vmatpush.xpose.msra.mxu1 %v70_v25 }
  0x40   :  { %96 = vmatpush.xpose.msra.mxu0 %v53_v26 }
  0x41   :  { %116 = vmatpush.xpose.msra.mxu1 %v69_v27 }
  0x44   :  { %97 = vmatpush.xpose.msra.mxu0 %v52_v28 }
  0x45   :  { %117 = vmatpush.xpose.msra.mxu1 %v68_v29 }
  0x48   :  { %98 = vmatpush.xpose.msra.mxu0 %v51_v30 }
  0x49   :  { %118 = vmatpush.xpose.msra.mxu1 %v67_v31 }
  0x4b   :  { %99 = vmatmul.f32.vlgmr.msra.gmra.mxu0 %v50_v32 }
  0x4c   :  { %119 = vmatmul.f32.vlgmr.msra.gmra.mxu1 %v50_v32 }
  0xc8   :  { %v100_v33 = vpop.f32.mrf.mxu0 }
  0xc9   :  { %v120_v34 = vpop.f32.mrf.mxu1  ;;  %125 = vst [vmem:[#allocation7] sm:$0xff] %v100_v33 }
  0xca   :  { %126 = vst [vmem:[#allocation7 + $0x8] sm:$0xff] %v120_v34 }
  0xcb   :  { %137 = dma.vmem_to_hbm [thread:$0]  %s133_s1, 256, %s135_s23, [#allocation4]  }
  0xcc   :  { %227 = dma.done.wait [#allocation4], 256  }
  0xcd   :  { %228 = vsyncadd [#allocation4], 4294967040 }
  0xce   :  { %142 = vsyncpa [#allocation3], 1 }
  0xcf   :  { %143 = vsyncpa [#allocation6], 1 }
  0xd0   :  { %144 = vsyncpa [#allocation4], 1 }

</bundles_post_ra>
